<compile_context>
chip_gen: v5e
topology: v5e:2x2
jax: 0.10.0
libtpu: 0.0.40
codegen_flags: <defaults>
</compile_context>

<pallas_src>
import functools

import jax
import jax.numpy as jnp
from jax.experimental import pallas as pl
from jax.experimental.pallas import tpu as pltpu

_LANES = 128


def _round_up(x, m):
    return ((x + m - 1) // m) * m


def _choose_tile_b(B, K, itemsize=4, budget_bytes=8 << 20):
    """Largest lane-multiple batch tile whose double-buffered (value + out)
    footprint (2 arrays x 2 buffers x K x TILE_B x itemsize) fits `budget_bytes`."""
    b_needed = _round_up(max(B, 1), _LANES)
    max_tile = budget_bytes // (4 * K * itemsize)
    max_tile = max(_LANES, (max_tile // _LANES) * _LANES)
    return int(min(max_tile, b_needed))


def _softplus(x):
    # numerically stable softplus: max(x, 0) + log1p(exp(-|x|))  (EUP ops)
    return jnp.maximum(x, 0.0) + jnp.log1p(jnp.exp(-jnp.abs(x)))


def _constraint_kernel(value_ref, bound_ref, mult_ref, out_ref, *, flip):
    # value_ref/out_ref: (K, TILE_B)   bound_ref/mult_ref: (K, 1), grid-invariant.
    mult = _softplus(mult_ref[...])                     # (K, 1), EUP
    if flip:                                            # 'le'
        loss = value_ref[...] - bound_ref[...]
    else:                                               # 'ge' / 'eq'
        loss = bound_ref[...] - value_ref[...]
    out_ref[...] = loss * mult                          # one vsub + one vmul per vreg


@functools.partial(jax.jit, static_argnames=("relation", "tile_b"))
def constraint_forward(value, bound, multiplier_param, relation="ge", tile_b=None):
    """Pallas implementation of Constraint.forward (alpha == 0 path).

    Args:
      value:            (B, K) float -- the quantity being constrained.
      bound:            (K,)   float -- constraint bound(s).
      multiplier_param: (K,)   float -- pre-activation Lagrange multiplier(s).
      relation:         'ge' | 'le' | 'eq'  ('eq' uses the same sign as 'ge',
                        matching the reference module).
      tile_b:           optional batch tile (multiple of 128); auto-chosen if None.
    Returns:
      (B, K) float32: loss * softplus(multiplier_param)
    """
    if relation not in ("ge", "le", "eq"):
        raise ValueError(f"Unknown relation: {relation}")

    value = value.astype(jnp.float32)
    B, K = value.shape
    bound_c = bound.reshape(K, 1).astype(jnp.float32)
    mult_c = multiplier_param.reshape(K, 1).astype(jnp.float32)

    if tile_b is None:
        tile_b = _choose_tile_b(B, K)
    elif tile_b <= 0 or tile_b % _LANES != 0:
        raise ValueError("tile_b must be a positive multiple of 128")

    # Lane-dense layout: constraint dim K -> sublanes, batch -> lanes.
    value_t = value.T                                   # (K, B)

    kernel = functools.partial(_constraint_kernel, flip=(relation == "le"))

    out_t = pl.pallas_call(
        kernel,
        out_shape=jax.ShapeDtypeStruct((K, B), jnp.float32),
        grid=(pl.cdiv(B, tile_b),),                     # ragged edge handled by Pallas
        in_specs=[
            pl.BlockSpec((K, tile_b), lambda i: (0, i)),   # value, streamed over batch
            pl.BlockSpec((K, 1), lambda i: (0, 0)),        # bound, resident
            pl.BlockSpec((K, 1), lambda i: (0, 0)),        # multiplier, resident
        ],
        out_specs=pl.BlockSpec((K, tile_b), lambda i: (0, i)),
        compiler_params=pltpu.CompilerParams(
            dimension_semantics=("parallel",),             # megacore sharding on v7x
        ),
    )(value_t, bound_c, mult_c)

    # Restore (B, K).
    return out_t.T


def reference_forward(value, bound, multiplier_param, relation="ge"):
    """Pure-JAX reference matching the PyTorch module (alpha == 0)."""
    mult = jax.nn.softplus(multiplier_param)
    if relation in ("ge", "eq"):
        loss = bound[None, :] - value
    else:  # 'le'
        loss = value - bound[None, :]
    return loss * mult[None, :]


if __name__ == "__main__":
    key = jax.random.PRNGKey(0)
    K = 4  # number of parallel constraints

    # Deterministic parameter init mirroring __init__:
    #   bound: list of floats -> torch.Tensor(bound)
    #   _multiplier: torch.full((len(bound),), start_val) with start_val = 0.0
    bound = jnp.array([0.5, 1.0, -0.25, 2.0], dtype=jnp.float32)
    multiplier_param = jnp.full((K,), 0.0, dtype=jnp.float32)

    # Case 1: small batch (single ragged block, boundary handled by Pallas).
    B = 8
    k1, k2 = jax.random.split(key)
    value = jax.random.normal(k1, (B, K), dtype=jnp.float32)

    out = jax.block_until_ready(constraint_forward(value, bound, multiplier_param, "ge"))
    ref = reference_forward(value, bound, multiplier_param, "ge")
    assert out.shape == (B, K)
    assert jnp.allclose(out, ref, atol=1e-5, rtol=1e-5), "mismatch vs reference (ge)"

    out_le = jax.block_until_ready(constraint_forward(value, bound, multiplier_param, "le"))
    ref_le = reference_forward(value, bound, multiplier_param, "le")
    assert jnp.allclose(out_le, ref_le, atol=1e-5, rtol=1e-5), "mismatch vs reference (le)"

    # Case 2: ragged batch with a small forced tile -> multi-block grid + ragged edge.
    B2 = 300
    value2 = jax.random.normal(k2, (B2, K), dtype=jnp.float32)
    out2 = jax.block_until_ready(
        constraint_forward(value2, bound, multiplier_param, "ge", tile_b=128)
    )
    ref2 = reference_forward(value2, bound, multiplier_param, "ge")
    assert out2.shape == (B2, K)
    assert jnp.allclose(out2, ref2, atol=1e-5, rtol=1e-5), "mismatch vs reference (tiled)"

    print("KERNEL_OK")
</pallas_src>

<mosaic_0001>
module attributes {stable_mosaic.version = 11 : i64} {
  func.func @_constraint_kernel(%arg0: i32, %arg1: memref<4x128xf32, #tpu.memory_space<vmem>>, %arg2: memref<4x1xf32, #tpu.memory_space<vmem>>, %arg3: memref<4x1xf32, #tpu.memory_space<vmem>>, %arg4: memref<4x128xf32, #tpu.memory_space<vmem>>) attributes {dimension_semantics = [#tpu.dimension_semantics<parallel>], iteration_bounds = array<i64: 1>, scalar_prefetch = 0 : i64, scratch_operands = 0 : i64, tpu.core_type = #tpu.core_type<tc>, window_params = [{transform_indices = @transform_0, window_bounds = array<i64: 4, 128>}, {pipeline_mode = #tpu.pipeline_mode<synchronous>, transform_indices = @transform_1, window_bounds = array<i64: 4, 1>}, {pipeline_mode = #tpu.pipeline_mode<synchronous>, transform_indices = @transform_2, window_bounds = array<i64: 4, 1>}, {transform_indices = @transform_3, window_bounds = array<i64: 4, 128>}]} {
    %c0 = arith.constant 0 : index
    %c0_0 = arith.constant 0 : index
    %0 = vector.load %arg3[%c0, %c0_0] : memref<4x1xf32, #tpu.memory_space<vmem>>, vector<4x1xf32>
    %cst = arith.constant 0.000000e+00 : f32
    %1 = vector.broadcast %cst : f32 to vector<4x1xf32>
    %2 = arith.maximumf %0, %1 : vector<4x1xf32>
    %3 = math.absf %0 : vector<4x1xf32>
    %cst_1 = arith.constant 0.000000e+00 : f32
    %4 = vector.broadcast %cst_1 : f32 to vector<4x1xf32>
    %5 = arith.subf %4, %3 : vector<4x1xf32>
    %6 = math.exp %5 : vector<4x1xf32>
    %7 = math.log1p %6 : vector<4x1xf32>
    %8 = arith.addf %2, %7 : vector<4x1xf32>
    %c0_2 = arith.constant 0 : index
    %c0_3 = arith.constant 0 : index
    %9 = vector.load %arg2[%c0_2, %c0_3] : memref<4x1xf32, #tpu.memory_space<vmem>>, vector<4x1xf32>
    %c0_4 = arith.constant 0 : index
    %c0_5 = arith.constant 0 : index
    %10 = vector.load %arg1[%c0_4, %c0_5] : memref<4x128xf32, #tpu.memory_space<vmem>>, vector<4x128xf32>
    %11 = vector.broadcast %9 : vector<4x1xf32> to vector<4x128xf32>
    %12 = arith.subf %11, %10 : vector<4x128xf32>
    %13 = vector.broadcast %8 : vector<4x1xf32> to vector<4x128xf32>
    %14 = arith.mulf %12, %13 : vector<4x128xf32>
    %c0_6 = arith.constant 0 : index
    %c0_7 = arith.constant 0 : index
    %15 = vector.load %arg4[%c0_6, %c0_7] : memref<4x128xf32, #tpu.memory_space<vmem>>, vector<4x128xf32>
    tpu.vector_store %arg4[%c0_6, %c0_7], %14 {strides = array<i32>} : memref<4x128xf32, #tpu.memory_space<vmem>>, vector<4x128xf32>,
    return
  }
  func.func @transform_0(%arg0: i32) -> (i32, i32) {
    %c0_i32 = arith.constant 0 : i32
    %c0_i32_0 = arith.constant 0 : i32
    return %c0_i32, %arg0 : i32, i32
  }
  func.func @transform_1(%arg0: i32) -> (i32, i32) {
    %c0_i32 = arith.constant 0 : i32
    %c0_i32_0 = arith.constant 0 : i32
    %c0_i32_1 = arith.constant 0 : i32
    return %c0_i32, %c0_i32_0 : i32, i32
  }
  func.func @transform_2(%arg0: i32) -> (i32, i32) {
    %c0_i32 = arith.constant 0 : i32
    %c0_i32_0 = arith.constant 0 : i32
    %c0_i32_1 = arith.constant 0 : i32
    return %c0_i32, %c0_i32_0 : i32, i32
  }
  func.func @transform_3(%arg0: i32) -> (i32, i32) {
    %c0_i32 = arith.constant 0 : i32
    %c0_i32_0 = arith.constant 0 : i32
    return %c0_i32, %arg0 : i32, i32
  }
}

</mosaic_0001>

<bundles_post_ra>
// kernel: constraint_forward.1
= control target key start
LH: loop header
LB: loop body
LE: loop exit
PB: predicated region body
PF: predicated region fallthrough
CT: control target
= control target key end

     0   :  { %v95_v2 = vmov 0   ;;  %s129_s0 = inlined_call_operand.vmem [shape: f32[4,8], index: 0, kind: input, shape index: {}]   ;;  %s130_s1 = inlined_call_operand.vmem [shape: f32[4,1], index: 1, kind: input, shape index: {}]   ;;  %s131_s2 = inlined_call_operand.vmem [shape: f32[4,1], index: 2, kind: input, shape index: {}]   ;;  %s132_s3 = inlined_call_operand.hbm [shape: f32[4,8], index: 3, kind: output, shape index: {}]  }
   0x1   :  { %v31_v0 = vld [vmem:[%s130_s1] sm:$0xf]  ;;  %64 = vset.pattern.permute.xlu0 %v95_v2 }
   0x2   :  { %v15_v1 = vld [vmem:[%s131_s2] sm:$0xf]  ;;  %35 = vperm.xlu0 %64, %v31_v0  }
   0x3   :  { %v17_v3 = vand.u32 2147483647, %v15_v1 }
   0x4   :  { %8 = vsyncpa [#allocation3], 0  ;;  %v16_v13 = vmax.f32 %v15_v1, 0.0  ;;  %v32_v18 = vld [vmem:[%s129_s0] sm:$0xf]  ;;  %s96_s16 = smov [#allocation2]  }
   0x5   :  { %v18_v4 = vsub.f32 0.0, %v17_v3  ;;  %s51_s17 = sshll.u32 %s96_s16, 4  ;;  %s53_s20 = sshll.u32 %s132_s3, 4  ;;  %s52_s17 = int_to_ptr.vmem [resolvable:$true] %s51_s17  ;;  %s54_s20 = int_to_ptr.hbm [resolvable:$true] %s53_s20 }
   0x7   :  { %v19_v5 = vmul.f32 1.442695, %v18_v4 }
   0x9   :  { %65 = vpow2.f32 %v19_v5 }
   0xf   :  { %v66_v6 = vpop.eup %65 }
  0x10   :  { %v21_v7 = vadd.f32 1.0, %v66_v6  ;;  %v24_v8 = vmul.f32 -0.5, %v66_v6  ;;  %v27_v10 = vand.u32 2147483647, %v66_v6 }
  0x12   :  { %67 = vlog2.f32 %v21_v7  ;;  %v25_v9 = vadd.f32 1.0, %v24_v8  ;;  %vm28_vm0 = vcmp.lt.f32.partialorder %v27_v10, 0.0004427343 }
  0x14   :  { %v26_v11 = vmul.f32 %v66_v6, %v25_v9 }
  0x18   :  { %v68_v12 = vpop.eup %67 }
  0x19   :  { %v23_v14 = vmul.f32 0.6931472, %v68_v12 }
  0x1b   :  { %v29_v15 = vsel %vm28_vm0, %v26_v11, %v23_v14 }
  0x1c   :  { %v30_v16 = vadd.f32 %v29_v15, %v16_v13 }
  0x1e   :  { %41 = vperm.xlu0 %64, %v30_v16  }
  0x74   :  { %v36_v17 = vpop.permute.xlu0 %35 }
  0x75   :  { %v38_v19 = vsub.f32 %v36_v17, %v32_v18 }
  0x90   :  { %v42_v20 = vpop.permute.xlu0 %41 }
  0x91   :  { %v44_v21 = vmul.f32 %v42_v20, %v38_v19 }
  0x93   :  { %45 = vst [vmem:[#allocation2] sm:$0xf] %v44_v21 }
  0x94   :  { %56 = dma.vmem_to_hbm [thread:$0]  %s52_s17, 64, %s54_s20, [#allocation3]  }
  0x95   :  { %93 = dma.done.wait [#allocation3], 64  }
  0x96   :  { %94 = vsyncadd [#allocation3], 4294967232 }
  0x97   :  { %61 = vsyncpa [#allocation3], 1 }

</bundles_post_ra>
